<compile_context>
chip_gen: v6e
topology: v6e:2x2x1
jax: 0.10.0
libtpu: 0.0.40
codegen_flags: <defaults>
</compile_context>

<pallas_src>
import jax
import jax.numpy as jnp
from jax import lax
from jax.experimental import pallas as pl
from jax.experimental.pallas import tpu as pltpu


def _round_up(n, m):
    return ((n + m - 1) // m) * m


def gating_kernel(x_ref, w1t_ref, b1t_ref, w23t_ref, b23t_ref, o_ref):
    # x tile arrives in f32 (no wrapper-side cast/pad pass); cast to bf16
    # in-kernel so both MXU operands take the bf16 path (f32 accumulate).
    x_bf = x_ref[...].astype(jnp.bfloat16)                        # (tile_b, D)

    # Transposed (batch-on-lanes) compute: all elementwise / EUP / reduce work
    # below runs on lane-dense (*, tile_b) vregs.
    # hT = relu(w1^T @ x^T + b1^T)  -> (H, tile_b)
    h_t = lax.dot_general(
        w1t_ref[...], x_bf,
        (((1,), (1,)), ((), ())),               # contract D with D (A @ B^T form)
        preferred_element_type=jnp.float32)
    h_t = jnp.maximum(h_t + b1t_ref[...], 0.0)

    # scoresT = (w2 @ w3)^T @ hT + (b2 @ w3 + b3)^T  -> (E, tile_b)
    s_t = jnp.dot(w23t_ref[...], h_t.astype(jnp.bfloat16),
                  preferred_element_type=jnp.float32)
    s_t = s_t + b23t_ref[...]

    # Numerically stable softmax over the expert axis (sublane axis, size E).
    m = jnp.max(s_t, axis=0, keepdims=True)
    e = jnp.exp(s_t - m)
    denom = jnp.sum(e, axis=0, keepdims=True)
    o_ref[...] = (e * pl.reciprocal(denom, approx=False)).astype(o_ref.dtype)


def gating_network(x, w1, b1, w2, b2, w3, b3, *, tile_b=1024,
                   transposed_output=False):
    """GatingNetwork forward.

    x: (B, D) float32 (streamed as-is; bf16 cast happens in-kernel).
    Weights stored (in, out):  w1 (D,H), b1 (1,H), w2 (H,10), b2 (1,10),
    w3 (10,E), b3 (1,E)  — i.e. PyTorch Linear weights transposed.
    Returns softmax(expert_scores): (B, E), or (E, B) lane-dense if
    transposed_output=True (skips the final cheap transpose).
    """
    B, D = x.shape
    H = w1.shape[1]
    E = w3.shape[1]

    # One-time, tiny parameter prep (ideally hoisted to parameter-load time):
    # fold proj_to_experts into the second linear and pre-transpose everything
    # for the lane-dense (batch-on-lanes) kernel layout.
    w1f = jnp.asarray(w1, jnp.float32)
    w2f = jnp.asarray(w2, jnp.float32)
    w3f = jnp.asarray(w3, jnp.float32)
    w1_t = w1f.T.astype(jnp.bfloat16)                              # (H, D)
    b1_t = jnp.asarray(b1, jnp.float32).reshape(H, 1)              # (H, 1)
    w23_t = (w2f @ w3f).T.astype(jnp.bfloat16)                     # (E, H)
    b23_t = (jnp.asarray(b2, jnp.float32) @ w3f
             + jnp.asarray(b3, jnp.float32)).reshape(E, 1)         # (E, 1)

    # Batch tile: large (amortizes ~0.35us/grid-step), multiple of 128 (lane-
    # dense output blocks), and >= 2 grid steps whenever B > 128 so the
    # "parallel" batch axis can use both v7x TensorCores.  VMEM is a non-issue
    # at these sizes on all generations (incl. v7x's 64 MiB).
    if B <= 128:
        tb = B                                     # single full-extent block
    else:
        tb = _round_up(min(tile_b, pl.cdiv(B, 2)), 128)
    grid = (pl.cdiv(B, tb),)
    # Ragged B: handled by Pallas boundary masking (no jnp.pad copy of x).
    # The padded tail columns of the last block compute garbage that is never
    # written back.

    cost = pl.CostEstimate(
        flops=2 * B * (D * H + H * E),
        transcendentals=B * E,
        bytes_accessed=B * D * 4 + B * E * 4 + (H * D + E * H) * 2 + (H + E) * 4,
    )

    out_t = pl.pallas_call(
        gating_kernel,
        out_shape=jax.ShapeDtypeStruct((E, B), jnp.float32),
        grid_spec=pltpu.PrefetchScalarGridSpec(
            num_scalar_prefetch=0,
            grid=grid,
            in_specs=[
                pl.BlockSpec((tb, D), lambda i: (i, 0)),   # x tile (streamed f32)
                pl.BlockSpec((H, D), lambda i: (0, 0)),    # w1^T        (resident)
                pl.BlockSpec((H, 1), lambda i: (0, 0)),    # b1^T        (resident)
                pl.BlockSpec((E, H), lambda i: (0, 0)),    # (w2@w3)^T   (resident)
                pl.BlockSpec((E, 1), lambda i: (0, 0)),    # (b2@w3+b3)^T(resident)
            ],
            out_specs=pl.BlockSpec((E, tb), lambda i: (0, i)),
        ),
        compiler_params=pltpu.CompilerParams(
            dimension_semantics=("parallel",),
        ),
        cost_estimate=cost,
    )(x, w1_t, b1_t, w23_t, b23_t)

    if transposed_output:
        return out_t                 # (E, B) lane-dense, no extra pass
    return out_t.T                   # (B, E) module semantics (tiny transpose)


if __name__ == "__main__":
    input_dim, hidden, num_experts = 32, 32, 4

    key = jax.random.PRNGKey(0)
    kx, k1, k2, k3, k4, k5, k6 = jax.random.split(key, 7)

    # Parameters stored (in, out) so the math is x @ W + b (== PyTorch Linear
    # with the weight transposed).
    w1 = 0.1 * jax.random.normal(k1, (input_dim, hidden), dtype=jnp.float32)
    b1 = 0.1 * jax.random.normal(k2, (1, hidden), dtype=jnp.float32)
    w2 = 0.1 * jax.random.normal(k3, (hidden, 10), dtype=jnp.float32)
    b2 = 0.1 * jax.random.normal(k4, (1, 10), dtype=jnp.float32)
    w3 = 0.1 * jax.random.normal(k5, (10, num_experts), dtype=jnp.float32)
    b3 = 0.1 * jax.random.normal(k6, (1, num_experts), dtype=jnp.float32)

    def reference_f32(x):
        # Full f32 PyTorch-equivalent math (loose tolerance: module semantics).
        h = jnp.maximum(x @ w1 + b1, 0.0)
        return jax.nn.softmax((h @ w2 + b2) @ w3 + b3, axis=1)

    def reference_bf16(x):
        # Same bf16-rounded operands in f32 (tight tolerance: kernel structure).
        x32 = x.astype(jnp.bfloat16).astype(jnp.float32)
        w1_32 = w1.astype(jnp.bfloat16).astype(jnp.float32)
        w23_32 = (w2 @ w3).astype(jnp.bfloat16).astype(jnp.float32)
        b23_32 = b2 @ w3 + b3
        h = jnp.maximum(x32 @ w1_32 + b1, 0.0)
        hb = h.astype(jnp.bfloat16).astype(jnp.float32)
        return jax.nn.softmax(hb @ w23_32 + b23_32, axis=1)

    # batch=256: even grid (2 x 128-row tiles).  batch=200: ragged final block
    # handled by Pallas boundary masking (no padded copy of x).
    for batch in (256, 200):
        x = jax.random.normal(kx, (batch, input_dim), dtype=jnp.float32)
        out = jax.block_until_ready(gating_network(x, w1, b1, w2, b2, w3, b3))

        assert out.shape == (batch, num_experts)
        assert jnp.allclose(out, reference_bf16(x), atol=2e-3), \
            f"mismatch vs bf16 reference (batch={batch})"
        assert jnp.allclose(out, reference_f32(x), atol=5e-2), \
            f"mismatch vs f32 reference (batch={batch})"
        assert jnp.allclose(jnp.sum(out, axis=1), 1.0, atol=1e-3), \
            f"rows do not sum to 1 (batch={batch})"

    print("KERNEL_OK")
</pallas_src>

<mosaic_0001>
module attributes {stable_mosaic.version = 11 : i64} {
  func.func @gating_kernel(%arg0: i32, %arg1: memref<128x32xf32, #tpu.memory_space<vmem>>, %arg2: memref<32x32xbf16, #tpu.memory_space<vmem>>, %arg3: memref<32x1xf32, #tpu.memory_space<vmem>>, %arg4: memref<4x32xbf16, #tpu.memory_space<vmem>>, %arg5: memref<4x1xf32, #tpu.memory_space<vmem>>, %arg6: memref<4x128xf32, #tpu.memory_space<vmem>>) attributes {dimension_semantics = [#tpu.dimension_semantics<parallel>], iteration_bounds = array<i64: 2>, scalar_prefetch = 0 : i64, scratch_operands = 0 : i64, tpu.core_type = #tpu.core_type<tc>, window_params = [{transform_indices = @transform_0, window_bounds = array<i64: 128, 32>}, {pipeline_mode = #tpu.pipeline_mode<synchronous>, transform_indices = @transform_1, window_bounds = array<i64: 32, 32>}, {pipeline_mode = #tpu.pipeline_mode<synchronous>, transform_indices = @transform_2, window_bounds = array<i64: 32, 1>}, {pipeline_mode = #tpu.pipeline_mode<synchronous>, transform_indices = @transform_3, window_bounds = array<i64: 4, 32>}, {pipeline_mode = #tpu.pipeline_mode<synchronous>, transform_indices = @transform_4, window_bounds = array<i64: 4, 1>}, {transform_indices = @transform_5, window_bounds = array<i64: 4, 128>}]} {
    %c0 = arith.constant 0 : index
    %c0_0 = arith.constant 0 : index
    %0 = vector.load %arg1[%c0, %c0_0] : memref<128x32xf32, #tpu.memory_space<vmem>>, vector<128x32xf32>
    %1 = arith.truncf %0 : vector<128x32xf32> to vector<128x32xbf16>
    %c0_1 = arith.constant 0 : index
    %c0_2 = arith.constant 0 : index
    %2 = vector.load %arg2[%c0_1, %c0_2] : memref<32x32xbf16, #tpu.memory_space<vmem>>, vector<32x32xbf16>
    %cst = arith.constant dense<0.000000e+00> : vector<32x128xf32>
    %3 = tpu.matmul %2, %1, %cst {dimension_numbers = #tpu.dot_dimension_numbers<[1], [1], [0], [0], [0, 0, 1, 0], [], []>} : vector<32x32xbf16>, vector<128x32xbf16>, vector<32x128xf32> -> vector<32x128xf32>
    %c0_3 = arith.constant 0 : index
    %c0_4 = arith.constant 0 : index
    %4 = vector.load %arg3[%c0_3, %c0_4] : memref<32x1xf32, #tpu.memory_space<vmem>>, vector<32x1xf32>
    %5 = vector.broadcast %4 : vector<32x1xf32> to vector<32x128xf32>
    %6 = arith.addf %3, %5 : vector<32x128xf32>
    %cst_5 = arith.constant 0.000000e+00 : f32
    %7 = vector.broadcast %cst_5 : f32 to vector<32x128xf32>
    %8 = arith.maximumf %6, %7 : vector<32x128xf32>
    %c0_6 = arith.constant 0 : index
    %c0_7 = arith.constant 0 : index
    %9 = vector.load %arg4[%c0_6, %c0_7] : memref<4x32xbf16, #tpu.memory_space<vmem>>, vector<4x32xbf16>
    %10 = arith.truncf %8 : vector<32x128xf32> to vector<32x128xbf16>
    %cst_8 = arith.constant dense<0.000000e+00> : vector<4x128xf32>
    %11 = tpu.matmul %9, %10, %cst_8 {dimension_numbers = #tpu.dot_dimension_numbers<[1], [0], [0], [1], [0, 0, 1, 1], [], []>} : vector<4x32xbf16>, vector<32x128xbf16>, vector<4x128xf32> -> vector<4x128xf32>
    %c0_9 = arith.constant 0 : index
    %c0_10 = arith.constant 0 : index
    %12 = vector.load %arg5[%c0_9, %c0_10] : memref<4x1xf32, #tpu.memory_space<vmem>>, vector<4x1xf32>
    %13 = vector.broadcast %12 : vector<4x1xf32> to vector<4x128xf32>
    %14 = arith.addf %11, %13 : vector<4x128xf32>
    %cst_11 = arith.constant dense<0xFF800000> : vector<128xf32>
    %15 = vector.multi_reduction <maximumf>, %14, %cst_11 [0] : vector<4x128xf32> to vector<128xf32>
    %16 = vector.shape_cast %15 : vector<128xf32> to vector<1x128xf32>
    %17 = vector.broadcast %16 : vector<1x128xf32> to vector<4x128xf32>
    %18 = arith.subf %14, %17 : vector<4x128xf32>
    %19 = math.exp %18 : vector<4x128xf32>
    %cst_12 = arith.constant dense<0.000000e+00> : vector<128xf32>
    %20 = vector.multi_reduction <add>, %19, %cst_12 [0] : vector<4x128xf32> to vector<128xf32>
    %21 = vector.shape_cast %20 : vector<128xf32> to vector<1x128xf32>
    %22 = tpu.reciprocal %21 : vector<1x128xf32> -> vector<1x128xf32>
    %23 = vector.broadcast %22 : vector<1x128xf32> to vector<4x128xf32>
    %24 = arith.mulf %19, %23 : vector<4x128xf32>
    %c0_13 = arith.constant 0 : index
    %c0_14 = arith.constant 0 : index
    %25 = vector.load %arg6[%c0_13, %c0_14] : memref<4x128xf32, #tpu.memory_space<vmem>>, vector<4x128xf32>
    tpu.vector_store %arg6[%c0_13, %c0_14], %24 {strides = array<i32>} : memref<4x128xf32, #tpu.memory_space<vmem>>, vector<4x128xf32>,
    return
  }
  func.func @transform_0(%arg0: i32) -> (i32, i32) {
    %c0_i32 = arith.constant 0 : i32
    %c0_i32_0 = arith.constant 0 : i32
    return %arg0, %c0_i32 : i32, i32
  }
  func.func @transform_1(%arg0: i32) -> (i32, i32) {
    %c0_i32 = arith.constant 0 : i32
    %c0_i32_0 = arith.constant 0 : i32
    %c0_i32_1 = arith.constant 0 : i32
    return %c0_i32, %c0_i32_0 : i32, i32
  }
  func.func @transform_2(%arg0: i32) -> (i32, i32) {
    %c0_i32 = arith.constant 0 : i32
    %c0_i32_0 = arith.constant 0 : i32
    %c0_i32_1 = arith.constant 0 : i32
    return %c0_i32, %c0_i32_0 : i32, i32
  }
  func.func @transform_3(%arg0: i32) -> (i32, i32) {
    %c0_i32 = arith.constant 0 : i32
    %c0_i32_0 = arith.constant 0 : i32
    %c0_i32_1 = arith.constant 0 : i32
    return %c0_i32, %c0_i32_0 : i32, i32
  }
  func.func @transform_4(%arg0: i32) -> (i32, i32) {
    %c0_i32 = arith.constant 0 : i32
    %c0_i32_0 = arith.constant 0 : i32
    %c0_i32_1 = arith.constant 0 : i32
    return %c0_i32, %c0_i32_0 : i32, i32
  }
  func.func @transform_5(%arg0: i32) -> (i32, i32) {
    %c0_i32 = arith.constant 0 : i32
    %c0_i32_0 = arith.constant 0 : i32
    return %c0_i32, %arg0 : i32, i32
  }
}

</mosaic_0001>

<bundles_post_ra>
// kernel: tpu_custom_call.1
= control target key start
LH: loop header
LB: loop body
LE: loop exit
PB: predicated region body
PF: predicated region fallthrough
CT: control target
= control target key end

     0   :  { %10 = vsyncpa [#allocation3], 0  ;;  %s878_s0 = inlined_call_operand.vmem [shape: f32[256,32], index: 0, kind: input, shape index: {}]   ;;  %s879_s1 = inlined_call_operand.vmem [shape: bf16[32,32], index: 1, kind: input, shape index: {}]   ;;  %s880_s2 = inlined_call_operand.vmem [shape: f32[32,1], index: 2, kind: input, shape index: {}]   ;;  %s881_s3 = inlined_call_operand.vmem [shape: bf16[4,32], index: 3, kind: input, shape index: {}]   ;;  %s882_s4 = inlined_call_operand.vmem [shape: f32[4,1], index: 4, kind: input, shape index: {}]   ;;  %s883_s5 = inlined_call_operand.hbm [shape: f32[4,256], index: 5, kind: output, shape index: {}]  }
   0x1   :  { %12 = vsyncpa [#allocation3 + $0x1], 0  ;;  %s729_s18 = smov 0   ;;  %s731_s19 = smov 0  }
   0x2   :  { %s733_s20 = smov 0   ;;  %s735_s21 = smov 0  }
   0x3 LB: > { %s750_s22 = sadd.s32 4294967295, %s693_s21   ;;  %s518_s23 = sadd.s32 4294967294, %s693_s21   ;;  %s693_s21 = sphi %s735_s21, %s889_s21   ;;  %s689_s20 = sphi %s733_s20, %s888_s20   ;;  %s685_s19 = sphi %s731_s19, %s887_s19   ;;  %s681_s18 = sphi %s729_s18, %s886_s18  }
   0x4   : > { %s754_s24 = sadd.s32 1, %s693_s21   ;;  %s135_s25 = sadd.s32 1, %s689_s20 }
   0x5   : > { %s132_s26 = ssub.s32 %s693_s21, %s754_s24  ;;  %p145_p0 = scmp.ne.s32.totalorder %s689_s20, %s685_s19 }
   0x6   : > { %p133_p1 = scmp.eq.s32.totalorder %s132_s26, 0  ;;  %p146_p2 = scmp.eq.s32.totalorder %s750_s22, 1 }
   0x7   : > { %p151_p3 = scmp.ne.s32.totalorder %s685_s19, %s681_s18  ;;  %p152_p4 = scmp.eq.s32.totalorder %s518_s23, 1 }
   0x8   : > { %s765_s27 = scalar_select %p133_p1, %s689_s20, %s135_s25  }
   0x9   : > { %p767_p5 = por %p146_p2, %p145_p0  ;;  %p771_p6 = por %p152_p4, %p151_p3 }
   0xa   : > { %p521_p7 = scmp.ge.s32.totalorder %s693_s21, 1  ;;  %p191_p8 = scmp.lt.s32.totalorder %s693_s21, 3 }
   0xc   : > { %p192_p9 = pnand %p521_p7, %p191_p8 }
   0xd   : > { %s523_s30 = sshll.u32 (!%p192_p9), %s750_s22, 4  ;;  %s216_s10 = sand.u32 (!%p192_p9), 1, %s685_s19  }
   0xe   : > { %195 = sbr.rel (%p192_p9) target bundleno = 567 (0x237), region = 40  ;;  %p220_p10 = scmp.lt.s32.totalorder (!%p192_p9), %s523_s30, 31 }
   0xf   : > { %s522_s11 = sshll.u32 (!%p192_p9), %s216_s10, 2  ;;  %s446_s23 = scalar_lea.sflag (!%p192_p9), [#allocation3], %s216_s10 }
  0x10   : > { %s218_s13 = scalar_lea.vmem (!%p192_p9), [#allocation2], %s522_s11  ;;  %s698_s26 = smov (!%p192_p9), [#allocation2]  }
  0x11   : > { %s459_s14 = sshll.u32 (!%p192_p9), %s218_s13, 4  ;;  %s460_s14 = int_to_ptr.vmem [resolvable:$true] %s459_s14 }
  0x12   : > { %s633_s25 = scalar_lea.vmem (!%p192_p9), %s460_s14, 64 }
  0x13   : > { %v627_v0 = vld [vmem:[%s879_s1] sm:$0xff]   ;;  %vm288_vm0 = vcmask 261120   ;;  %v256_v1 = vld [vmem:[%s880_s2 + $0x10] sm:$0xff]  ;;  %s891_s30 = smov (!%p220_p10, %s523_s30), 31  ;;  %v695_v2 = vmov 0   ;;  %v257_v4 = vld [vmem:[%s880_s2 + $0x18] sm:$0xff]  ;;  %p634_p11 = scmp.ne.s32.totalorder %s460_s14, %s633_s25 }
  0x14   : > { %563 = vmatprep.mubr.msk.bf16.mxu0 %vm288_vm0, %v627_v0  ;;  %625 = vset.pattern.permute.xlu0 %v695_v2  ;;  %v254_v3 = vld [vmem:[%s880_s2] sm:$0xff]  ;;  %s524_s12 = sshll.u32 %s891_s30, 3  ;;  %v255_v5 = vld [vmem:[%s880_s2 + $0x8] sm:$0xff]  ;;  %v696_v40 = vmov 0.0   ;;  %vm697_vm1 = vmmov 0   ;;  %vm424_vm2 = vcmask 1043456  }
  0x15   : > { %270 = vperm.xlu0 %625, %v256_v1   ;;  %626 = vset.pattern.permute.xlu1 %v695_v2  ;;  %s794_s17 = scalar_lea.vmem %s878_s0, %s524_s12  ;;  %v375_v12 = vld [vmem:[%s882_s4] sm:$0xf]  ;;  %v628_v39 = vld [vmem:[%s879_s1 + $0x8] sm:$0xff]   ;;  %s531_s12 = sshll.u32 %s750_s22, 6 }
  0x16   : > { %260 = vperm.xlu1 %626, %v254_v3   ;;  %v240_v6 = vld [vmem:[%s794_s17 + $0x70] sm:$0xff]  ;;  %v241_v7 = vld [vmem:[%s794_s17 + $0x78] sm:$0xff]  ;;  %v238_v8 = vld [vmem:[%s794_s17 + $0x60] sm:$0xff]  ;;  %567 = vmatprep.subr.bf16.mxu1 %v696_v40  ;;  %p635_p12 = pnand %p634_p11, %p767_p5  ;;  %s637_s30 = sshll.u32 %s698_s26, 4  ;;  %s638_s30 = int_to_ptr.vmem [resolvable:$false] %s637_s30 }
  0x17   : > { %v249_v9 = vpack.c.bf16 %v241_v7, %v240_v6  ;;  %v239_v10 = vld [vmem:[%s794_s17 + $0x68] sm:$0xff]  ;;  %v236_v14 = vld [vmem:[%s794_s17 + $0x50] sm:$0xff]  ;;  %v237_v15 = vld [vmem:[%s794_s17 + $0x58] sm:$0xff]  ;;  %571 = vmatprep.mubr.msk.bf16.mxu1 %vm697_vm1, %v696_v40  ;;  %s639_s22 = scalar_lea.vmem %s638_s30, 128  ;;  %p640_p0 = scmp.lt.s32.totalorder %s460_s14, %s638_s30 }
  0x18   : > { %v248_v11 = vpack.c.bf16 %v239_v10, %v238_v8  ;;  %v247_v17 = vpack.c.bf16 %v237_v15, %v236_v14  ;;  %v234_v18 = vld [vmem:[%s794_s17 + $0x40] sm:$0xff]  ;;  %v235_v19 = vld [vmem:[%s794_s17 + $0x48] sm:$0xff]  ;;  %v232_v22 = vld [vmem:[%s794_s17 + $0x30] sm:$0xff]  ;;  %p636_p13 = pneg %p635_p12  ;;  %p641_p1 = scmp.lt.s32.totalorder %s639_s22, %s633_s25 }
  0x19   : > { %275 = vperm.xlu0 %625, %v257_v4   ;;  %575 = vmatprep.subr.msk.bf16.mxu0 %vm288_vm0, %v249_v9  ;;  %v317_v13 = vsel %vm288_vm0, %v249_v9, 0  ;;  %v246_v21 = vpack.c.bf16 %v235_v19, %v234_v18  ;;  %v233_v23 = vld [vmem:[%s794_s17 + $0x38] sm:$0xff]  ;;  %v230_v26 = vld [vmem:[%s794_s17 + $0x20] sm:$0xff]  ;;  %v231_v27 = vld [vmem:[%s794_s17 + $0x28] sm:$0xff] }
  0x1a   : > { %265 = vperm.xlu1 %626, %v255_v5   ;;  %548 = vmatpush3.bf16.xpose.msra.mxu0 %v317_v13  ;;  %v314_v16 = vsel %vm288_vm0, %v248_v11, 0  ;;  %v311_v20 = vsel %vm288_vm0, %v247_v17, 0  ;;  %v245_v25 = vpack.c.bf16 %v233_v23, %v232_v22  ;;  %v244_v29 = vpack.c.bf16 %v231_v27, %v230_v26  ;;  %v228_v30 = vld [vmem:[%s794_s17 + $0x10] sm:$0xff]  ;;  %v229_v31 = vld [vmem:[%s794_s17 + $0x18] sm:$0xff]  ;;  %v226_v34 = vld [vmem:[%s794_s17] sm:$0xff]  ;;  %p642_p2 = por %p641_p1, %p640_p0 }
  0x1b   : > { %576 = vmatprep.subr.msk.bf16.mxu0 %vm288_vm0, %v248_v11  ;;  %v308_v24 = vsel %vm288_vm0, %v246_v21, 0  ;;  %v243_v33 = vpack.c.bf16 %v229_v31, %v228_v30  ;;  %v227_v35 = vld [vmem:[%s794_s17 + $0x8] sm:$0xff]  ;;  %v372_v59 = vld [vmem:[%s881_s3] sm:$0x3]  ;;  %s457_s17 = scalar_lea.hbm %s883_s5, %s531_s12 }
  0x1c   : > { %v305_v28 = vsel %vm288_vm0, %v245_v25, 0  ;;  %v302_v32 = vsel %vm288_vm0, %v244_v29, 0  ;;  %v242_v37 = vpack.c.bf16 %v227_v35, %v226_v34  ;;  %p643_p3 = pnand %p642_p2, %p636_p13 }
  0x1d   : > { %378 = vperm.xlu0 %625, %v375_v12   ;;  %v299_v36 = vsel %vm288_vm0, %v243_v33, 0 }
  0x1e   : > { %v296_v38 = vsel %vm288_vm0, %v242_v37, 0 }
  0x22   : > { %550 = vmatpush3.bf16.xpose.msra.mxu0 %v314_v16 }
  0x23   : > { %577 = vmatprep.subr.msk.bf16.mxu0 %vm288_vm0, %v247_v17 }
  0x2a   : > { %552 = vmatpush3.bf16.xpose.msra.mxu0 %v311_v20 }
  0x2b   : > { %578 = vmatprep.subr.msk.bf16.mxu0 %vm288_vm0, %v246_v21 }
  0x32   : > { %554 = vmatpush3.bf16.xpose.msra.mxu0 %v308_v24 }
  0x33   : > { %579 = vmatprep.subr.msk.bf16.mxu0 %vm288_vm0, %v245_v25 }
  0x3a   : > { %556 = vmatpush3.bf16.xpose.msra.mxu0 %v305_v28 }
  0x3b   : > { %580 = vmatprep.subr.msk.bf16.mxu0 %vm288_vm0, %v244_v29 }
  0x42   : > { %558 = vmatpush3.bf16.xpose.msra.mxu0 %v302_v32 }
  0x43   : > { %581 = vmatprep.subr.msk.bf16.mxu0 %vm288_vm0, %v243_v33 }
  0x4a   : > { %560 = vmatpush3.bf16.xpose.msra.mxu0 %v299_v36 }
  0x4b   : > { %582 = vmatprep.subr.msk.bf16.mxu0 %vm288_vm0, %v242_v37 }
  0x52   : > { %562 = vmatpush3.bf16.xpose.msra.mxu0 %v296_v38 }
  0x59   : > { %564 = vmatmul.mubr.msk.bf16.vlgmr.msra.gmra.mxu0 %vm288_vm0, %v628_v39 }
  0x90   : > { %v271_v41 = vpop.permute.xlu0 %270 }
  0x91   : > { %v261_v42 = vpop.permute.xlu1 %260 }
  0x94   : > { %v276_v46 = vpop.permute.xlu0 %275 }
  0x95   : > { %v266_v49 = vpop.permute.xlu1 %265 }
  0x98   : > { %v379_v60 = vpop.permute.xlu0 %378 }
 0x119   : > { %v565_v43 = vpop.f32.mrf.mxu0 }
 0x11a   : > { %v362_v45 = vadd.f32 %v565_v43, %v271_v41 }
 0x11b   : > { %v353_v44 = vpop.f32.mrf.mxu0 }
 0x11c   : > { %v370_v51 = vmax.f32 %v362_v45, 0.0  ;;  %v354_v52 = vadd.f32 %v353_v44, %v261_v42 }
 0x11d   : > { %v566_v47 = vpop.f32.mrf.mxu0 }
 0x11e   : > { %v365_v48 = vadd.f32 %v566_v47, %v276_v46  ;;  %v368_v57 = vmax.f32 %v354_v52, 0.0 }
 0x11f   : > { %v356_v50 = vpop.f32.mrf.mxu0 }
 0x120   : > { %v371_v53 = vmax.f32 %v365_v48, 0.0  ;;  %v357_v54 = vadd.f32 %v356_v50, %v266_v49 }
 0x122   : > { %v369_v55 = vmax.f32 %v357_v54, 0.0  ;;  %v374_v56 = vpack.c.bf16 %v371_v53, %v370_v51 }
 0x124   : > { %568 = vmatpush3.bf16.msra.mxu1 %v374_v56  ;;  %v373_v58 = vpack.c.bf16 %v369_v55, %v368_v57 }
 0x125   : > { %569 = vmatprep.subr.bf16.mxu1 %v696_v40 }
 0x128   : > { %570 = vmatpush3.bf16.msra.mxu1 %v373_v58 }
 0x12b   : > { %572 = vmatmul.mubr.msk.bf16.vlgmr.msra.gmra.mxu1 %vm288_vm0, %v372_v59 }
 0x1eb   : > { %v418_v61 = vpop.f32.mrf.mxu1 }
 0x1ec   : > { %v419_v62 = vadd.f32 %v418_v61, %v379_v60 }
 0x1ed   : > { %v573_v63 = vpop.f32.mrf.mxu1 }
 0x1ee   : > { %v425_v0 = vsel %vm424_vm2, %v419_v62, -inf }
 0x1ef   : > { %v426_v1 = vrot.slane %v425_v0, 4  ;;  %v421_v2 = vpop.f32.mrf.mxu1 }
 0x1f1   : > { %v427_v3 = vmax.f32 %v425_v0, %v426_v1  ;;  %v574_v4 = vpop.f32.mrf.mxu1 }
 0x1f3   : > { %v428_v5 = vrot.slane %v427_v3, 2 }
 0x1f5   : > { %v429_v6 = vmax.f32 %v427_v3, %v428_v5 }
 0x1f7   : > { %v430_v7 = vrot.slane %v429_v6, 1 }
 0x1f9   : > { %v431_v8 = vmax.f32 %v429_v6, %v430_v7 }
 0x1fb   : > { %v432_v9 = vsub.f32 %v419_v62, %v431_v8 }
 0x1fd   : > { %v433_v10 = vmul.f32 1.442695, %v432_v9 }
 0x1ff   : > { %629 = vpow2.f32 %v433_v10 }
 0x20c   : > { %v630_v11 = vpop.eup %629 }
 0x20d   : > { %v435_v12 = vsel %vm424_vm2, %v630_v11, 0.0 }
 0x20e   : > { %v436_v13 = vrot.slane %v435_v12, 4 }
 0x210   : > { %v437_v14 = vadd.f32 %v436_v13, %v435_v12 }
 0x212   : > { %v438_v15 = vrot.slane %v437_v14, 2 }
 0x214   : > { %v439_v16 = vadd.f32 %v438_v15, %v437_v14 }
 0x216   : > { %v440_v17 = vrot.slane %v439_v16, 1 }
 0x218   : > { %v441_v18 = vadd.f32 %v440_v17, %v439_v16 }
 0x21a   : > { %631 = vrcp.f32 %v441_v18 }
 0x227   : > { %v632_v19 = vpop.eup %631 }
 0x228   : > { %v443_v20 = vmul.f32 %v632_v19, %v630_v11 }
 0x22a   : > { %444 = vst [vmem:[%s218_s13] sm:$0xf] %v443_v20 }
 0x22b   : > { %646 = shalt.err (!%p643_p3)
}
 0x22c   : > { %s647_s6 = scalar_lea.hbm %s457_s17, 64  ;;  %s651_s9 = scalar_lea.hbm %s883_s5, 128 }
 0x22d   : > { %p648_p4 = scmp.ne.s32.totalorder %s457_s17, %s647_s6  ;;  %p652_p9 = scmp.lt.s32.totalorder %s457_s17, %s883_s5 }
 0x22e   : > { %p653_p10 = scmp.lt.s32.totalorder %s651_s9, %s647_s6 }
 0x22f   : > { %p649_p7 = pnand %p648_p4, %p767_p5 }
 0x230   : > { %p654_p11 = por %p653_p10, %p652_p9 }
 0x231   : > { %p650_p8 = pneg %p649_p7 }
 0x233   : > { %p655_p12 = pnand %p654_p11, %p650_p8 }
 0x235   : > { %658 = shalt.err (!%p655_p12)
}
 0x236   : > { %583 = dma.vmem_to_hbm [thread:$0]  (%p767_p5), %s460_s14, 64, %s457_s17, %s446_s23  }
 0x237 PF: > { %p589_p13 = scmp.ge.s32.totalorder %s693_s21, 2  ;;  %s471_s12 = sand.u32 1, %s681_s18  }
 0x238   : > { %s472_s13 = scalar_lea.sflag [#allocation3], %s471_s12 }
 0x239   : > { %p586_p0 = pnand %p589_p13, %p771_p6 }
 0x23b   : > { %p587_p1 = pneg %p586_p0 }
 0x23d   : > { %676 = dma.done.wait (%p587_p1), %s472_s13, 64  }
 0x23e   : > { %678 = vsyncadd (%p587_p1), %s472_s13, 4294967232  ;;  %p15_p2 = scmp.ge.s32.totalorder %s754_s24, 4   ;;  %s886_s18 = smov %s685_s19 }
 0x23f   : > { %s887_s19 = smov %s689_s20  ;;  %s888_s20 = smov %s765_s27 }
 0x240   : > { %s889_s21 = smov %s754_s24  ;;  %17 = sbr.rel (!%p15_p2) target bundleno = 3 (0x3), region = 75 }
 0x245   :  { %477 = vsyncpa [#allocation3], 1 }
 0x246   :  { %479 = vsyncpa [#allocation3 + $0x1], 1 }

</bundles_post_ra>
